<compile_context>
chip_gen: v6e
topology: v6e:2x2x1
jax: 0.10.0
libtpu: 0.0.40
codegen_flags: <defaults>
</compile_context>

<pallas_src>
import jax
import jax.numpy as jnp
from jax import lax
from jax.experimental import pallas as pl
from jax.experimental.pallas import tpu as pltpu


def _bf16_elementwise_ok():
    """bf16 bias-add/tanh only where the VPU/EUP has a native bf16 path."""
    try:
        kind = jax.devices()[0].device_kind.lower()
    except Exception:  # pragma: no cover - conservative fallback
        return False
    return ("v6" in kind) or ("v7" in kind)


def _pick_block_b(B, *, max_blk=4096, min_blk=128, min_blocks=8):
    """Largest 128-multiple tile (<= max_blk) that keeps >= min_blocks grid steps.

    Keeps at least ~4 blocks per TensorCore on v7x (2 TCs) so the batch axis
    still pipelines / megacore-splits before we amortize step overhead with
    bigger tiles.
    """
    blk = min_blk
    while blk * 2 <= max_blk and pl.cdiv(B, blk * 2) >= min_blocks:
        blk *= 2
    return blk


def _make_mlp_kernel(n_layers, use_bf16_ew):
    """refs = (x, W0t, b0, W1t, b1, ..., out_t).

    x   : (blk, total_in)     f32   -- contiguous HBM block, cast to bf16 here
    Wlt : (out_l, in_l)       bf16  -- resident across grid steps (layer 0 is
                                       zero-padded over the shape_input cols)
    bl  : (out_l, 1)          bf16/f32 -- lane-broadcast bias
    out : (latent_dim, blk)   bf16  -- lane-dense writeback (batch on lanes)
    """

    def _act(acc_f32, b):
        if use_bf16_ew:
            # v6e/v7x: bf16 bias-add + tanh (native VPU/EUP), already MXU-ready.
            return jnp.tanh(acc_f32.astype(jnp.bfloat16) + b)
        # v5e / unknown: f32 elementwise, single down-cast for the next MXU op.
        return jnp.tanh(acc_f32 + b).astype(jnp.bfloat16)

    def kernel(*refs):
        x_ref = refs[0]
        out_ref = refs[-1]
        wb = refs[1:-1]

        xb = x_ref[...].astype(jnp.bfloat16)              # (blk, total_in)

        # Layer 0: contract the feature axis of both operands (no transpose of
        # the activations is ever materialized): (out0, in) . (blk, in)^T.
        w0 = wb[0][...]
        b0 = wb[1][...]
        acc = lax.dot_general(
            w0, xb,
            dimension_numbers=(((1,), (1,)), ((), ())),
            preferred_element_type=jnp.float32,
        )                                                  # (out0, blk) f32
        h = _act(acc, b0)                                  # bf16 (out0, blk)

        for l in range(1, n_layers):
            w = wb[2 * l][...]                             # (out_l, in_l) bf16
            b = wb[2 * l + 1][...]                         # (out_l, 1)
            acc = jnp.dot(w, h, preferred_element_type=jnp.float32)
            h = _act(acc, b)                               # bf16 (out_l, blk)

        out_ref[...] = h.astype(out_ref.dtype)             # bf16 lane-dense

    return kernel


def parameter_network_pallas(inputs, params, shape_i_dim, *,
                             max_block_b=4096, min_block_b=128, min_blocks=8):
    """Run the parameter-net MLP (Linear+Tanh chain) in one Pallas kernel.

    inputs: (B, total_in) f32 -- the FULL forward input; the param slice is
            fused into the first layer via zero-padded weight columns.
    params: flat list [W0, b0, W1, b1, ...] with Wl: (in_l, out_l), bl: (1, out_l)
            (layer 0 has in_0 == generated_unit).
    Returns latent in (latent_dim, B) bf16 layout (batch on the lane axis).
    """
    B, total_in = inputs.shape
    n_layers = len(params) // 2
    latent_dim = params[-1].shape[-1]
    use_bf16_ew = _bf16_elementwise_ok()

    # ---- tiny host-side layout prep (one shot, negligible) ----------------
    bias_dtype = jnp.bfloat16 if use_bf16_ew else jnp.float32
    wts, bs = [], []
    for l in range(n_layers):
        wt = params[2 * l].T                                  # (out_l, in_l)
        if l == 0:
            # Fuse inputs[:, shape_i_dim:]: zero columns for shape_input rows.
            zero = jnp.zeros((wt.shape[0], shape_i_dim), wt.dtype)
            wt = jnp.concatenate([zero, wt], axis=1)          # (out_0, total_in)
        wts.append(wt.astype(jnp.bfloat16))
        bs.append(params[2 * l + 1].reshape(-1, 1).astype(bias_dtype))

    blk = _pick_block_b(B, max_blk=max_block_b, min_blk=min_block_b,
                        min_blocks=min_blocks)
    grid = (pl.cdiv(B, blk),)                                 # ragged last block ok

    in_specs = [pl.BlockSpec((blk, total_in), lambda i: (i, 0))]
    flat_params = []
    for wt, b in zip(wts, bs):
        in_specs.append(pl.BlockSpec(wt.shape, lambda i: (0, 0)))   # resident
        in_specs.append(pl.BlockSpec(b.shape, lambda i: (0, 0)))    # resident
        flat_params += [wt, b]
    out_spec = pl.BlockSpec((latent_dim, blk), lambda i: (0, i))

    flops = 2 * B * sum(int(w.shape[0]) * int(w.shape[1]) for w in wts)
    transcendentals = B * sum(int(w.shape[0]) for w in wts)
    bytes_accessed = (B * total_in * 4 + B * latent_dim * 2
                      + sum(int(w.size) * 2 for w in wts)
                      + sum(int(b.size) * int(b.dtype.itemsize) for b in bs))

    latent_t = pl.pallas_call(
        _make_mlp_kernel(n_layers, use_bf16_ew),
        out_shape=jax.ShapeDtypeStruct((latent_dim, B), jnp.bfloat16),
        grid=grid,
        in_specs=in_specs,
        out_specs=out_spec,
        compiler_params=pltpu.CompilerParams(
            dimension_semantics=("parallel",),   # megacore split on v7x
        ),
        cost_estimate=pl.CostEstimate(
            flops=flops,
            transcendentals=transcendentals,
            bytes_accessed=bytes_accessed,
        ),
    )(inputs, *flat_params)

    return latent_t                                           # (latent_dim, B) bf16


def nif_paper_forward(inputs, params, shape_i_dim, *,
                      max_block_b=4096, min_block_b=128, min_blocks=8):
    """Mirrors NIF_Paper.forward. Returns (forward_output, latent_space).

    forward_output == shape_input (the literal return of the reference
    `_call_shape_network`); latent_space is the parameter-net output computed
    along the way, produced by the Pallas kernel.
    """
    shape_input = inputs[:, :shape_i_dim]
    latent_t = parameter_network_pallas(
        inputs, params, shape_i_dim,
        max_block_b=max_block_b, min_block_b=min_block_b, min_blocks=min_blocks,
    )
    # Reference layout is (B, latent_dim) f32; the transpose runs on bf16 data
    # and the upcast fuses into it.  Consumers that accept (latent_dim, B) bf16
    # can use parameter_network_pallas() directly and skip this relayout.
    latent_space = latent_t.T.astype(jnp.float32)
    return shape_input, latent_space


def _reference_mlp_jax(x, params):
    """Pure-JAX f32 reference for the parameter network (validation)."""
    h = x
    for l in range(len(params) // 2):
        h = jnp.tanh(
            jnp.dot(h, params[2 * l], precision=jax.lax.Precision.HIGHEST)
            + params[2 * l + 1]
        )
    return h


if __name__ == "__main__":
    # Small config consistent with the module's __init__.
    cfg_shape_net = {"input_dim": 2, "output_dim": 1, "hidden_units": [32, 32]}
    cfg_param_net = {"input_dim": 2, "generated_unit": 8, "hidden_units": [32, 32]}

    shape_i_dim = cfg_shape_net["input_dim"]
    generated_unit = cfg_param_net["generated_unit"]
    # TODO(synk): param_latent_dim undefined in reference __init__; intended value:
    param_latent_dim = generated_unit * shape_i_dim + generated_unit  # 24

    B = 1000                                     # exercises grid (8 blocks) + ragged tail
    total_in_dim = shape_i_dim + generated_unit  # forward slices inputs this way

    key = jax.random.PRNGKey(0)
    key, k_in = jax.random.split(key)
    inputs = jax.random.normal(k_in, (B, total_in_dim), jnp.float32)

    # Deterministic parameter-net weights (PyTorch-style uniform init),
    # stored as (in, out) and bias as (1, out).
    dims = [generated_unit] + cfg_param_net["hidden_units"] + [param_latent_dim]
    params = []
    for i in range(len(dims) - 1):
        key, kw, kb = jax.random.split(key, 3)
        bound = 1.0 / (dims[i] ** 0.5)
        W = jax.random.uniform(kw, (dims[i], dims[i + 1]), jnp.float32, -bound, bound)
        b = jax.random.uniform(kb, (1, dims[i + 1]), jnp.float32, -bound, bound)
        params += [W, b]

    fwd = jax.jit(nif_paper_forward, static_argnums=(2,))
    out, latent = fwd(inputs, params, shape_i_dim)
    jax.block_until_ready((out, latent))

    # Sanity checks against pure-JAX (f32) semantics. bf16 MXU operands, bf16
    # latent writeback (and bf16 tanh on v6e/v7x) on tanh-bounded values stay
    # well within 3e-2 absolute.
    latent_ref = _reference_mlp_jax(inputs[:, shape_i_dim:], params)
    assert out.shape == (B, shape_i_dim)
    assert latent.shape == (B, param_latent_dim)
    assert jnp.allclose(out, inputs[:, :shape_i_dim])
    assert jnp.allclose(latent, latent_ref, atol=3e-2, rtol=3e-2), (
        float(jnp.max(jnp.abs(latent - latent_ref)))
    )

    print("KERNEL_OK")
</pallas_src>

<mosaic_0001>
module attributes {stable_mosaic.version = 11 : i64} {
  func.func @kernel(%arg0: i32, %arg1: memref<128x10xf32, #tpu.memory_space<vmem>>, %arg2: memref<32x10xbf16, #tpu.memory_space<vmem>>, %arg3: memref<32x1xf32, #tpu.memory_space<vmem>>, %arg4: memref<32x32xbf16, #tpu.memory_space<vmem>>, %arg5: memref<32x1xf32, #tpu.memory_space<vmem>>, %arg6: memref<24x32xbf16, #tpu.memory_space<vmem>>, %arg7: memref<24x1xf32, #tpu.memory_space<vmem>>, %arg8: memref<24x128xbf16, #tpu.memory_space<vmem>>) attributes {dimension_semantics = [#tpu.dimension_semantics<parallel>], iteration_bounds = array<i64: 8>, scalar_prefetch = 0 : i64, scratch_operands = 0 : i64, tpu.core_type = #tpu.core_type<tc>, window_params = [{transform_indices = @transform_0, window_bounds = array<i64: 128, 10>}, {pipeline_mode = #tpu.pipeline_mode<synchronous>, transform_indices = @transform_1, window_bounds = array<i64: 32, 10>}, {pipeline_mode = #tpu.pipeline_mode<synchronous>, transform_indices = @transform_2, window_bounds = array<i64: 32, 1>}, {pipeline_mode = #tpu.pipeline_mode<synchronous>, transform_indices = @transform_3, window_bounds = array<i64: 32, 32>}, {pipeline_mode = #tpu.pipeline_mode<synchronous>, transform_indices = @transform_4, window_bounds = array<i64: 32, 1>}, {pipeline_mode = #tpu.pipeline_mode<synchronous>, transform_indices = @transform_5, window_bounds = array<i64: 24, 32>}, {pipeline_mode = #tpu.pipeline_mode<synchronous>, transform_indices = @transform_6, window_bounds = array<i64: 24, 1>}, {transform_indices = @transform_7, window_bounds = array<i64: 24, 128>}]} {
    %c0 = arith.constant 0 : index
    %c0_0 = arith.constant 0 : index
    %0 = vector.load %arg1[%c0, %c0_0] : memref<128x10xf32, #tpu.memory_space<vmem>>, vector<128x10xf32>
    %1 = arith.truncf %0 : vector<128x10xf32> to vector<128x10xbf16>
    %c0_1 = arith.constant 0 : index
    %c0_2 = arith.constant 0 : index
    %2 = vector.load %arg2[%c0_1, %c0_2] : memref<32x10xbf16, #tpu.memory_space<vmem>>, vector<32x10xbf16>
    %c0_3 = arith.constant 0 : index
    %c0_4 = arith.constant 0 : index
    %3 = vector.load %arg3[%c0_3, %c0_4] : memref<32x1xf32, #tpu.memory_space<vmem>>, vector<32x1xf32>
    %cst = arith.constant dense<0.000000e+00> : vector<32x128xf32>
    %4 = tpu.matmul %2, %1, %cst {dimension_numbers = #tpu.dot_dimension_numbers<[1], [1], [0], [0], [0, 0, 1, 0], [], []>} : vector<32x10xbf16>, vector<128x10xbf16>, vector<32x128xf32> -> vector<32x128xf32>
    %5 = vector.broadcast %3 : vector<32x1xf32> to vector<32x128xf32>
    %6 = arith.addf %4, %5 : vector<32x128xf32>
    %7 = math.tanh %6 : vector<32x128xf32>
    %8 = arith.truncf %7 : vector<32x128xf32> to vector<32x128xbf16>
    %c0_5 = arith.constant 0 : index
    %c0_6 = arith.constant 0 : index
    %9 = vector.load %arg4[%c0_5, %c0_6] : memref<32x32xbf16, #tpu.memory_space<vmem>>, vector<32x32xbf16>
    %c0_7 = arith.constant 0 : index
    %c0_8 = arith.constant 0 : index
    %10 = vector.load %arg5[%c0_7, %c0_8] : memref<32x1xf32, #tpu.memory_space<vmem>>, vector<32x1xf32>
    %cst_9 = arith.constant dense<0.000000e+00> : vector<32x128xf32>
    %11 = tpu.matmul %9, %8, %cst_9 {dimension_numbers = #tpu.dot_dimension_numbers<[1], [0], [0], [1], [0, 0, 1, 1], [], []>} : vector<32x32xbf16>, vector<32x128xbf16>, vector<32x128xf32> -> vector<32x128xf32>
    %12 = vector.broadcast %10 : vector<32x1xf32> to vector<32x128xf32>
    %13 = arith.addf %11, %12 : vector<32x128xf32>
    %14 = math.tanh %13 : vector<32x128xf32>
    %15 = arith.truncf %14 : vector<32x128xf32> to vector<32x128xbf16>
    %c0_10 = arith.constant 0 : index
    %c0_11 = arith.constant 0 : index
    %16 = vector.load %arg6[%c0_10, %c0_11] : memref<24x32xbf16, #tpu.memory_space<vmem>>, vector<24x32xbf16>
    %c0_12 = arith.constant 0 : index
    %c0_13 = arith.constant 0 : index
    %17 = vector.load %arg7[%c0_12, %c0_13] : memref<24x1xf32, #tpu.memory_space<vmem>>, vector<24x1xf32>
    %cst_14 = arith.constant dense<0.000000e+00> : vector<24x128xf32>
    %18 = tpu.matmul %16, %15, %cst_14 {dimension_numbers = #tpu.dot_dimension_numbers<[1], [0], [0], [1], [0, 0, 1, 1], [], []>} : vector<24x32xbf16>, vector<32x128xbf16>, vector<24x128xf32> -> vector<24x128xf32>
    %19 = vector.broadcast %17 : vector<24x1xf32> to vector<24x128xf32>
    %20 = arith.addf %18, %19 : vector<24x128xf32>
    %21 = math.tanh %20 : vector<24x128xf32>
    %22 = arith.truncf %21 : vector<24x128xf32> to vector<24x128xbf16>
    %c0_15 = arith.constant 0 : index
    %c0_16 = arith.constant 0 : index
    %23 = vector.load %arg8[%c0_15, %c0_16] : memref<24x128xbf16, #tpu.memory_space<vmem>>, vector<24x128xbf16>
    tpu.vector_store %arg8[%c0_15, %c0_16], %22 {strides = array<i32>} : memref<24x128xbf16, #tpu.memory_space<vmem>>, vector<24x128xbf16>,
    return
  }
  func.func @transform_0(%arg0: i32) -> (i32, i32) {
    %c0_i32 = arith.constant 0 : i32
    %c0_i32_0 = arith.constant 0 : i32
    return %arg0, %c0_i32 : i32, i32
  }
  func.func @transform_1(%arg0: i32) -> (i32, i32) {
    %c0_i32 = arith.constant 0 : i32
    %c0_i32_0 = arith.constant 0 : i32
    %c0_i32_1 = arith.constant 0 : i32
    return %c0_i32, %c0_i32_0 : i32, i32
  }
  func.func @transform_2(%arg0: i32) -> (i32, i32) {
    %c0_i32 = arith.constant 0 : i32
    %c0_i32_0 = arith.constant 0 : i32
    %c0_i32_1 = arith.constant 0 : i32
    return %c0_i32, %c0_i32_0 : i32, i32
  }
  func.func @transform_3(%arg0: i32) -> (i32, i32) {
    %c0_i32 = arith.constant 0 : i32
    %c0_i32_0 = arith.constant 0 : i32
    %c0_i32_1 = arith.constant 0 : i32
    return %c0_i32, %c0_i32_0 : i32, i32
  }
  func.func @transform_4(%arg0: i32) -> (i32, i32) {
    %c0_i32 = arith.constant 0 : i32
    %c0_i32_0 = arith.constant 0 : i32
    %c0_i32_1 = arith.constant 0 : i32
    return %c0_i32, %c0_i32_0 : i32, i32
  }
  func.func @transform_5(%arg0: i32) -> (i32, i32) {
    %c0_i32 = arith.constant 0 : i32
    %c0_i32_0 = arith.constant 0 : i32
    %c0_i32_1 = arith.constant 0 : i32
    return %c0_i32, %c0_i32_0 : i32, i32
  }
  func.func @transform_6(%arg0: i32) -> (i32, i32) {
    %c0_i32 = arith.constant 0 : i32
    %c0_i32_0 = arith.constant 0 : i32
    %c0_i32_1 = arith.constant 0 : i32
    return %c0_i32, %c0_i32_0 : i32, i32
  }
  func.func @transform_7(%arg0: i32) -> (i32, i32) {
    %c0_i32 = arith.constant 0 : i32
    %c0_i32_0 = arith.constant 0 : i32
    return %c0_i32, %arg0 : i32, i32
  }
}

</mosaic_0001>

<bundles_post_ra>
// kernel: nif_paper_forward.1
= control target key start
LH: loop header
LB: loop body
LE: loop exit
PB: predicated region body
PF: predicated region fallthrough
CT: control target
= control target key end

     0   :  { %s970_s24 = smov 0   ;;  %s972_s25 = smov 0   ;;  %s1111_s0 = inlined_call_operand.vmem [shape: f32[1000,10], index: 0, kind: input, shape index: {}]   ;;  %s1112_s1 = inlined_call_operand.vmem [shape: bf16[32,10], index: 1, kind: input, shape index: {}]   ;;  %s1113_s2 = inlined_call_operand.vmem [shape: f32[32,1], index: 2, kind: input, shape index: {}]   ;;  %s1114_s3 = inlined_call_operand.vmem [shape: bf16[32,32], index: 3, kind: input, shape index: {}]   ;;  %s1115_s4 = inlined_call_operand.vmem [shape: f32[32,1], index: 4, kind: input, shape index: {}]   ;;  %s1116_s5 = inlined_call_operand.vmem [shape: bf16[24,32], index: 5, kind: input, shape index: {}]   ;;  %s1117_s6 = inlined_call_operand.vmem [shape: f32[24,1], index: 6, kind: input, shape index: {}]   ;;  %s1118_s7 = inlined_call_operand.vmem [shape: bf16[24,1000], index: 7, kind: output, shape index: {}]  }
   0x1   :  { %s974_s26 = smov 0  }
   0x2 LB: > { %s983_s27 = sadd.s32 4294967295, %s927_s26   ;;  %s985_s28 = sadd.s32 1, %s927_s26   ;;  %s927_s26 = sphi %s974_s26, %s1122_s26   ;;  %s923_s25 = sphi %s972_s25, %s1121_s25   ;;  %s919_s24 = sphi %s970_s24, %s1120_s24  }
   0x3   : > { %s173_s29 = ssub.s32 %s927_s26, %s985_s28  ;;  %s176_s30 = sadd.s32 1, %s923_s25 }
   0x4   : > { %p174_p0 = scmp.eq.s32.totalorder %s173_s29, 0  ;;  %p186_p1 = scmp.ne.s32.totalorder %s923_s25, %s919_s24 }
   0x5   : > { %p187_p2 = scmp.eq.s32.totalorder %s983_s27, 7  ;;  %p758_p3 = scmp.ge.s32.totalorder %s927_s26, 1 }
   0x6   : > { %s993_s8 = scalar_select %p174_p0, %s923_s25, %s176_s30  }
   0x7   : > { %p995_p4 = por %p187_p2, %p186_p1  ;;  %p246_p5 = scmp.lt.s32.totalorder %s927_s26, 9 }
   0x9   : > { %p247_p6 = pnand %p758_p3, %p246_p5 }
   0xa   : > { %s759_s10 = sshll.u32 (!%p247_p6), %s983_s27, 4  ;;  %s278_s15 = sand.u32 (!%p247_p6), 1, %s919_s24  }
   0xb   : > { %250 = sbr.rel (%p247_p6) target bundleno = 758 (0x2f6), region = 48  ;;  %p286_p7 = scmp.lt.s32.totalorder (!%p247_p6), %s759_s10, 124 }
   0xc   : > { %s849_s16 = smul.u32 (!%p247_p6), 12, %s278_s15 }
  0x10   : > { %v877_v0 = vld [vmem:[%s1112_s1] sm:$0xff]   ;;  %vm358_vm0 = vcmask 80896   ;;  %v326_v1 = vld [vmem:[%s1113_s2 + $0x10] sm:$0xff]  ;;  %s1124_s10 = smov (!%p286_p7, %s759_s10), 124  ;;  %v929_v2 = vmov 0   ;;  %v327_v4 = vld [vmem:[%s1113_s2 + $0x18] sm:$0xff] }
  0x11   : > { %821 = vmatprep.mubr.msk.bf16.mxu0 %vm358_vm0, %v877_v0  ;;  %875 = vset.pattern.permute.xlu0 %v929_v2  ;;  %v324_v3 = vld [vmem:[%s1113_s2] sm:$0xff]  ;;  %s760_s17 = sshll.u32 %s1124_s10, 3  ;;  %v325_v5 = vld [vmem:[%s1113_s2 + $0x8] sm:$0xff]  ;;  %v450_v12 = vld [vmem:[%s1115_s4 + $0x10] sm:$0xff]  ;;  %vm482_vm1 = vcmask 261120   ;;  %s776_s18 = sshll.u32 (%p995_p4), %s983_s27, 2 }
  0x12   : > { %340 = vperm.xlu0 %875, %v326_v1   ;;  %876 = vset.pattern.permute.xlu1 %v929_v2  ;;  %s1019_s26 = scalar_lea.vmem %s1111_s0, %s760_s17  ;;  %v451_v14 = vld [vmem:[%s1115_s4 + $0x18] sm:$0xff]  ;;  %v448_v15 = vld [vmem:[%s1115_s4] sm:$0xff]  ;;  %v449_v18 = vld [vmem:[%s1115_s4 + $0x8] sm:$0xff]  ;;  %s280_s17 = scalar_lea.vmem [#allocation2], %s849_s16 }
  0x13   : > { %330 = vperm.xlu1 %876, %v324_v3   ;;  %v310_v6 = vld [vmem:[%s1019_s26 + $0x70] sm:$0xff]  ;;  %v311_v7 = vld [vmem:[%s1019_s26 + $0x78] sm:$0xff]  ;;  %v308_v8 = vld [vmem:[%s1019_s26 + $0x60] sm:$0xff]  ;;  %s654_s24 = scalar_lea.vmem (%p995_p4), %s1118_s7, %s776_s18 }
  0x14   : > { %v319_v9 = vpack.c.bf16 %v311_v7, %v310_v6  ;;  %v309_v10 = vld [vmem:[%s1019_s26 + $0x68] sm:$0xff]  ;;  %v306_v16 = vld [vmem:[%s1019_s26 + $0x50] sm:$0xff]  ;;  %v307_v17 = vld [vmem:[%s1019_s26 + $0x58] sm:$0xff] }
  0x15   : > { %v318_v11 = vpack.c.bf16 %v309_v10, %v308_v8  ;;  %v317_v20 = vpack.c.bf16 %v307_v17, %v306_v16  ;;  %v547_v21 = vld [vmem:[%s1117_s6] sm:$0xff]  ;;  %v548_v22 = vld [vmem:[%s1117_s6 + $0x8] sm:$0xff]  ;;  %v549_v25 = vld [vmem:[%s1117_s6 + $0x10] sm:$0xff] }
  0x16   : > { %345 = vperm.xlu0 %875, %v327_v4   ;;  %841 = vmatprep.subr.msk.bf16.mxu0 %vm358_vm0, %v319_v9  ;;  %v387_v13 = vsel %vm358_vm0, %v319_v9, 0  ;;  %v304_v23 = vld [vmem:[%s1019_s26 + $0x40] sm:$0xff]  ;;  %v305_v24 = vld [vmem:[%s1019_s26 + $0x48] sm:$0xff]  ;;  %v302_v28 = vld [vmem:[%s1019_s26 + $0x30] sm:$0xff] }
  0x17   : > { %335 = vperm.xlu1 %876, %v325_v5   ;;  %806 = vmatpush3.bf16.xpose.msra.mxu0 %v387_v13  ;;  %v384_v19 = vsel %vm358_vm0, %v318_v11, 0  ;;  %v381_v26 = vsel %vm358_vm0, %v317_v20, 0  ;;  %v316_v27 = vpack.c.bf16 %v305_v24, %v304_v23  ;;  %v303_v29 = vld [vmem:[%s1019_s26 + $0x38] sm:$0xff]  ;;  %v300_v32 = vld [vmem:[%s1019_s26 + $0x20] sm:$0xff]  ;;  %v301_v33 = vld [vmem:[%s1019_s26 + $0x28] sm:$0xff] }
  0x18   : > { %842 = vmatprep.subr.msk.bf16.mxu0 %vm358_vm0, %v318_v11  ;;  %v315_v31 = vpack.c.bf16 %v303_v29, %v302_v28  ;;  %v314_v35 = vpack.c.bf16 %v301_v33, %v300_v32  ;;  %v298_v36 = vld [vmem:[%s1019_s26 + $0x10] sm:$0xff]  ;;  %v299_v37 = vld [vmem:[%s1019_s26 + $0x18] sm:$0xff]  ;;  %v296_v40 = vld [vmem:[%s1019_s26] sm:$0xff] }
  0x19   : > { %v378_v30 = vsel %vm358_vm0, %v316_v27, 0  ;;  %v313_v39 = vpack.c.bf16 %v299_v37, %v298_v36  ;;  %v297_v41 = vld [vmem:[%s1019_s26 + $0x8] sm:$0xff]  ;;  %v879_v46 = vld [vmem:[%s1114_s3] sm:$0xff]  }
  0x1a   : > { %464 = vperm.xlu0 %875, %v450_v12   ;;  %v375_v34 = vsel %vm358_vm0, %v315_v31, 0  ;;  %v372_v38 = vsel %vm358_vm0, %v314_v35, 0  ;;  %v312_v43 = vpack.c.bf16 %v297_v41, %v296_v40  ;;  %v878_v45 = vld [vmem:[%s1112_s1 + $0x8] sm:$0xff]   ;;  %829 = vmatprep.mubr.msk.bf16.mxu1 %vm482_vm1, %v879_v46  ;;  %v881_v2 = vld [vmem:[%s1116_s5] sm:$0xff]  }
  0x1b   : > { %469 = vperm.xlu1 %876, %v451_v14   ;;  %v369_v42 = vsel %vm358_vm0, %v313_v39, 0  ;;  %v880_v1 = vld [vmem:[%s1114_s3 + $0x8] sm:$0xff]  }
  0x1c   : > { %v366_v44 = vsel %vm358_vm0, %v312_v43, 0 }
  0x1e   : > { %454 = vperm.xlu0 %875, %v448_v15  }
  0x1f   : > { %459 = vperm.xlu1 %876, %v449_v18   ;;  %808 = vmatpush3.bf16.xpose.msra.mxu0 %v384_v19 }
  0x20   : > { %843 = vmatprep.subr.msk.bf16.mxu0 %vm358_vm0, %v317_v20 }
  0x22   : > { %552 = vperm.xlu0 %875, %v547_v21   ;;  %v882_v21 = vld [vmem:[%s1116_s5 + $0x8] ss:$0 sps:$4 sm:$0xff]  }
  0x23   : > { %557 = vperm.xlu1 %876, %v548_v22  }
  0x26   : > { %562 = vperm.xlu0 %875, %v549_v25  }
  0x27   : > { %810 = vmatpush3.bf16.xpose.msra.mxu0 %v381_v26 }
  0x28   : > { %844 = vmatprep.subr.msk.bf16.mxu0 %vm358_vm0, %v316_v27 }
  0x2f   : > { %812 = vmatpush3.bf16.xpose.msra.mxu0 %v378_v30 }
  0x30   : > { %845 = vmatprep.subr.msk.bf16.mxu0 %vm358_vm0, %v315_v31 }
  0x37   : > { %814 = vmatpush3.bf16.xpose.msra.mxu0 %v375_v34 }
  0x38   : > { %846 = vmatprep.subr.msk.bf16.mxu0 %vm358_vm0, %v314_v35 }
  0x3f   : > { %816 = vmatpush3.bf16.xpose.msra.mxu0 %v372_v38 }
  0x40   : > { %847 = vmatprep.subr.msk.bf16.mxu0 %vm358_vm0, %v313_v39 }
  0x47   : > { %818 = vmatpush3.bf16.xpose.msra.mxu0 %v369_v42 }
  0x48   : > { %848 = vmatprep.subr.msk.bf16.mxu0 %vm358_vm0, %v312_v43 }
  0x4f   : > { %820 = vmatpush3.bf16.xpose.msra.mxu0 %v366_v44 }
  0x56   : > { %822 = vmatmul.mubr.msk.bf16.vlgmr.msra.gmra.mxu0 %vm358_vm0, %v878_v45 }
  0x8d   : > { %v341_v47 = vpop.permute.xlu0 %340 }
  0x8e   : > { %v331_v48 = vpop.permute.xlu1 %330 }
  0x91   : > { %v346_v52 = vpop.permute.xlu0 %345 }
  0x92   : > { %v336_v56 = vpop.permute.xlu1 %335 }
  0x95   : > { %v465_v3 = vpop.permute.xlu0 %464 }
  0x96   : > { %v470_v4 = vpop.permute.xlu1 %469 }
  0x99   : > { %v455_v8 = vpop.permute.xlu0 %454 }
  0x9a   : > { %v460_v12 = vpop.permute.xlu1 %459 }
  0x9d   : > { %v553_v22 = vpop.permute.xlu0 %552 }
  0x9e   : > { %v558_v29 = vpop.permute.xlu1 %557 }
  0xa1   : > { %v563_v23 = vpop.permute.xlu0 %562 }
 0x116   : > { %v823_v49 = vpop.f32.mrf.mxu0 }
 0x117   : > { %v432_v50 = vadd.f32 %v823_v49, %v341_v47 }
 0x118   : > { %v423_v51 = vpop.f32.mrf.mxu0 }
 0x119   : > { %v424_v53 = vadd.f32 %v423_v51, %v331_v48  ;;  %883 = vtanh.f32 %v432_v50 }
 0x11a   : > { %v824_v54 = vpop.f32.mrf.mxu0 }
 0x11b   : > { %v435_v55 = vadd.f32 %v824_v54, %v346_v52 }
 0x11c   : > { %v426_v57 = vpop.f32.mrf.mxu0 }
 0x11d   : > { %885 = vtanh.f32 %v435_v55  ;;  %v427_v58 = vadd.f32 %v426_v57, %v336_v56 }
 0x11e   : > { %887 = vtanh.f32 %v424_v53 }
 0x11f   : > { %889 = vtanh.f32 %v427_v58 }
 0x126   : > { %v884_v59 = vpop.eup %883 }
 0x12a   : > { %v886_v60 = vpop.eup %885 }
 0x12b   : > { %v888_v61 = vpop.eup %887  ;;  %v443_v62 = vpack.c.bf16 %v886_v60, %v884_v59 }
 0x12c   : > { %v890_v63 = vpop.eup %889 }
 0x12d   : > { %825 = vmatprep.subr.bf16.mxu1 %v443_v62  ;;  %v442_v0 = vpack.c.bf16 %v890_v63, %v888_v61 }
 0x12e   : > { %826 = vmatpush3.bf16.msra.mxu1 %v443_v62 }
 0x12f   : > { %827 = vmatprep.subr.bf16.mxu1 %v442_v0 }
 0x132   : > { %828 = vmatpush3.bf16.msra.mxu1 %v442_v0 }
 0x135   : > { %830 = vmatmul.mubr.msk.bf16.vlgmr.msra.gmra.mxu1 %vm482_vm1, %v880_v1 }
 0x136   : > { %837 = vmatprep.mubr.msk.bf16.mxu1 %vm482_vm1, %v881_v2 }
 0x1f5   : > { %v831_v5 = vpop.f32.mrf.mxu1 }
 0x1f6   : > { %v532_v6 = vadd.f32 %v831_v5, %v465_v3 }
 0x1f7   : > { %v523_v7 = vpop.f32.mrf.mxu1 }
 0x1f8   : > { %v524_v9 = vadd.f32 %v523_v7, %v455_v8  ;;  %891 = vtanh.f32 %v532_v6 }
 0x1f9   : > { %v832_v10 = vpop.f32.mrf.mxu1 }
 0x1fa   : > { %v535_v11 = vadd.f32 %v832_v10, %v470_v4 }
 0x1fb   : > { %v526_v13 = vpop.f32.mrf.mxu1 }
 0x1fc   : > { %893 = vtanh.f32 %v535_v11  ;;  %v527_v14 = vadd.f32 %v526_v13, %v460_v12 }
 0x1fd   : > { %895 = vtanh.f32 %v524_v9 }
 0x1fe   : > { %897 = vtanh.f32 %v527_v14 }
 0x205   : > { %v892_v15 = vpop.eup %891 }
 0x209   : > { %v894_v16 = vpop.eup %893 }
 0x20a   : > { %v896_v17 = vpop.eup %895  ;;  %v543_v18 = vpack.c.bf16 %v894_v16, %v892_v15 }
 0x20b   : > { %v898_v19 = vpop.eup %897 }
 0x20c   : > { %833 = vmatprep.subr.bf16.mxu1 %v543_v18  ;;  %v542_v20 = vpack.c.bf16 %v898_v19, %v896_v17 }
 0x20d   : > { %834 = vmatpush3.bf16.msra.mxu1 %v543_v18 }
 0x20e   : > { %835 = vmatprep.subr.bf16.mxu1 %v542_v20 }
 0x211   : > { %836 = vmatpush3.bf16.msra.mxu1 %v542_v20 }
 0x214   : > { %838 = vmatmul.mubr.msk.bf16.vlgmr.msra.gmra.mxu1 %vm482_vm1, %v882_v21 }
 0x2d4   : > { %v839_v24 = vpop.f32.mrf.mxu1 }
 0x2d5   : > { %v622_v25 = vadd.f32 %v839_v24, %v563_v23 }
 0x2d6   : > { %v613_v26 = vpop.f32.mrf.mxu1 }
 0x2d7   : > { %899 = vtanh.f32 %v622_v25  ;;  %v614_v27 = vadd.f32 %v613_v26, %v553_v22 }
 0x2d8   : > { %v840_v28 = vpop.f32.mrf.mxu1 }
 0x2d9   : > { %901 = vtanh.f32 %v614_v27 }
 0x2da   : > { %v616_v30 = vpop.f32.mrf.mxu1 }
 0x2db   : > { %v617_v31 = vadd.f32 %v616_v30, %v558_v29 }
 0x2dd   : > { %903 = vtanh.f32 %v617_v31 }
 0x2e4   : > { %v900_v32 = vpop.eup %899 }
 0x2e5   : > { %v781_v33 = vpack.c.bf16 %v900_v32, %v900_v32 }
 0x2e6   : > { %v902_v34 = vpop.eup %901 }
 0x2e7   : > { %645 = vst [vmem:[%s280_s17 + $0x8] sm:$0xf] %v781_v33 }
 0x2e9   : > { %652 = sbr.rel (!%p995_p4) target bundleno = 758 (0x2f6), region = 52 }
 0x2ea   : > { %v904_v35 = vpop.eup %903 }
 0x2eb   : > { %v785_v36 = vpack.c.bf16 %v904_v35, %v902_v34 }
 0x2ed   : > { %786 = vst [vmem:[%s280_s17] sm:$0xff] %v785_v36  }
 0x2ee   : > { %v675_v39 = vld [vmem:[%s280_s17 + $0x8] sm:$0xf] }
 0x2ef   : > { %676 = vst [vmem:[%s654_s24 + $0x40] sm:$0xf] %v675_v39 }
 0x2f4   : > { %v671_v37 = vld [vmem:[%s280_s17] sm:$0xf]  ;;  %v673_v38 = vld [vmem:[%s280_s17 + $0x4] sm:$0xf] }
 0x2f5   : > { %672 = vst [vmem:[%s654_s24] sm:$0xf] %v671_v37  ;;  %674 = vst [vmem:[%s654_s24 + $0x20] sm:$0xf] %v673_v38 }
 0x2f6 PF: > { %p14_p8 = scmp.ge.s32.totalorder %s985_s28, 10   ;;  %s1120_s24 = smov %s923_s25 }
 0x2f7   : > { %s1121_s25 = smov %s993_s8  ;;  %s1122_s26 = smov %s985_s28 }
 0x2f8   :  { %16 = sbr.rel (!%p14_p8) target bundleno = 2 (0x2), region = 119 }

</bundles_post_ra>
